<compile_context>
chip_gen: v5e
topology: v5e:2x2
jax: 0.10.0
libtpu: 0.0.40
codegen_flags: <defaults>
</compile_context>

<pallas_src>
import functools

import jax
import jax.numpy as jnp
from jax.experimental import pallas as pl
from jax.experimental.pallas import tpu as pltpu


def _vmem_limit_bytes():
    """Generation-aware scoped-VMEM cap: ~75% of physical VMEM, <= 96 MiB."""
    cap = 64 * 1024 * 1024
    try:
        info = pltpu.get_tpu_info()
        cap = int(getattr(info, "vmem_capacity_bytes", cap))
    except Exception:
        pass
    return max(32 * 1024 * 1024, min(cap * 3 // 4, 96 * 1024 * 1024))


_VMEM_LIMIT = _vmem_limit_bytes()


def _act_fn(y, act):
    if act in (None, "none", "linear"):
        return y
    if act == "relu":
        return jnp.maximum(y, 0.0)
    if act == "leaky_relu":
        return jnp.where(y >= 0, y, 0.2 * y)
    if act == "elu":
        return jnp.where(y >= 0, y, jnp.expm1(y))
    if act == "sigmoid":
        return jax.nn.sigmoid(y)
    if act == "tanh":
        return jnp.tanh(y)
    if act == "silu":
        return jax.nn.silu(y)
    if act == "gelu":
        return jax.nn.gelu(y)
    raise ValueError(f"unsupported activation: {act}")


def _pick_tile(s, k_rows, m_rows, batch, itemsize=4, target=2048):
    """Largest 128-multiple dividing s that fits the VMEM budget (K-aware)."""
    if s % 128 != 0:
        return s                                   # full-extent block (legal)
    per_lane = 2 * (k_rows + m_rows) * itemsize    # double-buffered in + out
    t_budget = max(128, ((_VMEM_LIMIT // 3) // per_lane) // 128 * 128)
    t = min(target, s, t_budget)
    t -= t % 128
    t = max(t, 128)
    while s % t != 0:
        t -= 128
    # v7x has 2 TensorCores: make sure the 'parallel' grid has >= 2 steps.
    while batch * (s // t) < 2 and t % 256 == 0 and s % (t // 2) == 0:
        t //= 2
    return t


# ---------------------------------------------------------------------------
# Kernel A: fused pointwise GEMM  Y = act(W @ X + b)
#   X tile (K, T): channels on sublanes, contiguous spatial pixels on lanes.
# Used for ConvTranspose2d(k=2, s=2) lowered to a per-pixel phase matmul.
# ---------------------------------------------------------------------------
def _matmul_bias_act_kernel(x_ref, w_ref, b_ref, o_ref, *, act):
    # TODO(synk): optionally cast MXU operands to bf16 (keep f32 accumulation)
    # for a compute win on large channel counts; needs a looser test tolerance.
    x = x_ref[0].astype(jnp.float32)                            # (K, T)
    w = w_ref[...].astype(jnp.float32)                          # (M, K)
    y = jnp.dot(w, x, preferred_element_type=jnp.float32)       # (M, T)
    y = _act_fn(y + b_ref[...].astype(jnp.float32), act)
    o_ref[0] = y.astype(o_ref.dtype)


def _channel_matmul(x, w, b, *, act=None):
    """x: (B, K, S) NC(HW)-flat; w: (M, K); b: (M, 1) -> (B, M, S)."""
    B, K, S = x.shape
    M = w.shape[0]
    T = _pick_tile(S, K, M, B)
    grid = (B, S // T)
    # TODO(synk): mark the constant-index weight/bias specs pl.Buffered(1) to
    # drop their second pipeline buffer (VMEM headroom on v7x).
    return pl.pallas_call(
        functools.partial(_matmul_bias_act_kernel, act=act),
        out_shape=jax.ShapeDtypeStruct((B, M, S), x.dtype),
        grid_spec=pltpu.PrefetchScalarGridSpec(
            num_scalar_prefetch=0,
            grid=grid,
            in_specs=[
                pl.BlockSpec((1, K, T), lambda bi, si: (bi, 0, si)),   # acts
                pl.BlockSpec((M, K), lambda bi, si: (0, 0)),           # weights
                pl.BlockSpec((M, 1), lambda bi, si: (0, 0)),           # bias
            ],
            out_specs=pl.BlockSpec((1, M, T), lambda bi, si: (bi, 0, si)),
        ),
        compiler_params=pltpu.CompilerParams(
            dimension_semantics=("parallel", "parallel"),
            vmem_limit_bytes=_VMEM_LIMIT),
    )(x, w, b)


# ---------------------------------------------------------------------------
# Kernel B: fused AttentionBlock + concat + DoubleConvBlock (conv1 + conv2).
#
# Inputs `up` and `bridge` arrive as zero-padded planes flattened to
# (C, Spp) with Spp = (H2+4) * (W2+2):  2 zero rows top/bottom, 1 zero column
# left/right, channels on sublanes, padded pixels on lanes.  In that layout a
# 3x3 'same' conv is exactly 9 MXU matmuls on static lane-offset slices
# (tap (ky,kx) -> slice start (ky+1)*Wp + kx - 1), so no im2col and no
# intermediate ever leaves VMEM.  The attention gate is pointwise, so it is
# computed on the same padded plane (padding stays exactly zero because
# bridge's padding is zero).  Pad columns of conv1's output are re-zeroed with
# a mask so conv2 sees correct 'same' padding.
# ---------------------------------------------------------------------------
def _attn_doubleconv_kernel(up_ref, br_ref, mask_ref,
                            wg_ref, wx_ref, bgx_ref, wp_ref, bp_ref,
                            w1u_ref, w1a_ref, b1_ref, w2_ref, b2_ref,
                            o_ref, z1_scr, *, wpad, h2, act):
    f32 = jnp.float32
    n = h2 * wpad                                   # output rows x padded width

    up = up_ref[0].astype(f32)                      # (C, Spp)
    br = br_ref[0].astype(f32)                      # (C, Spp)

    # ---- attention gate (batch_norm=None; biases bg+bx pre-folded) ---------
    wg = wg_ref[...].astype(f32)                    # (Cmid, C)
    wx = wx_ref[...].astype(f32)
    c = wg.shape[1]
    if c <= 8:
        # Tiny-K contraction: unrolled VPU FMAs, MXU stays free for the convs.
        g1 = wg[:, 0:1] * up[0:1, :]
        x1 = wx[:, 0:1] * br[0:1, :]
        for k in range(1, c):
            g1 = g1 + wg[:, k:k + 1] * up[k:k + 1, :]
            x1 = x1 + wx[:, k:k + 1] * br[k:k + 1, :]
    else:
        g1 = jnp.dot(wg, up, preferred_element_type=f32)
        x1 = jnp.dot(wx, br, preferred_element_type=f32)
    a = jnp.maximum(g1 + x1 + bgx_ref[...].astype(f32), 0.0)
    # Width-1 psi projection: VPU multiply + sublane reduce (no N=1 matmul).
    psi = jnp.sum(a * wp_ref[...].astype(f32), axis=0, keepdims=True)
    psi = jax.nn.sigmoid(psi + bp_ref[...].astype(f32))            # (1, Spp)
    attn = psi * br                                 # zero wherever bridge pad=0

    # ---- conv1: 3x3 'same' over concat([up, attn]) as 9 x 2 shifted taps ----
    c1 = b1_ref.shape[0]
    acc1 = jnp.zeros((c1, n), f32)
    for t in range(9):
        ky, kx = divmod(t, 3)
        s = (ky + 1) * wpad + (kx - 1)
        acc1 = acc1 + jnp.dot(w1u_ref[t].astype(f32), up[:, s:s + n],
                              preferred_element_type=f32)
        acc1 = acc1 + jnp.dot(w1a_ref[t].astype(f32), attn[:, s:s + n],
                              preferred_element_type=f32)
    y1 = _act_fn(acc1 + b1_ref[...].astype(f32), act)
    y1 = y1 * mask_ref[...].astype(f32)             # re-zero the pad columns

    # Rebuild conv1's output as a zero-padded plane in VMEM (never hits HBM).
    zband = jnp.zeros((c1, 2 * wpad), f32)
    z1_scr[:, pl.ds(0, 2 * wpad)] = zband
    z1_scr[:, pl.ds(2 * wpad, n)] = y1
    z1_scr[:, pl.ds(2 * wpad + n, 2 * wpad)] = zband

    # ---- conv2: same 9-tap scheme on the VMEM-resident padded plane ---------
    c2 = b2_ref.shape[0]
    acc2 = jnp.zeros((c2, n), f32)
    for t in range(9):
        ky, kx = divmod(t, 3)
        s = (ky + 1) * wpad + (kx - 1)
        acc2 = acc2 + jnp.dot(w2_ref[t].astype(f32), z1_scr[:, pl.ds(s, n)],
                              preferred_element_type=f32)
    y2 = _act_fn(acc2 + b2_ref[...].astype(f32), act)
    o_ref[0] = y2.astype(o_ref.dtype)


def _attn_doubleconv(up_pf, br_pf, mask, wg, wx, bgx, wp_col, bp,
                     w1u, w1a, b1, w2t, b2, *, wpad, h2, act):
    B, C, Spp = up_pf.shape
    cmid = wg.shape[0]
    m1 = b1.shape[0]
    m2 = b2.shape[0]
    n = h2 * wpad
    # TODO(synk): for large planes / channels, tile the output over row bands
    # with a 1-row halo DMA (pl.Element or manual make_async_copy) and over M
    # tiles; currently one full plane per batch element lives in VMEM.
    kernel = functools.partial(_attn_doubleconv_kernel,
                               wpad=wpad, h2=h2, act=act)
    return pl.pallas_call(
        kernel,
        out_shape=jax.ShapeDtypeStruct((B, m2, n), up_pf.dtype),
        grid_spec=pltpu.PrefetchScalarGridSpec(
            num_scalar_prefetch=0,
            grid=(B,),
            in_specs=[
                pl.BlockSpec((1, C, Spp), lambda b: (b, 0, 0)),     # up (padded)
                pl.BlockSpec((1, C, Spp), lambda b: (b, 0, 0)),     # bridge (padded)
                pl.BlockSpec((1, n), lambda b: (0, 0)),             # column mask
                pl.BlockSpec((cmid, C), lambda b: (0, 0)),          # Wg
                pl.BlockSpec((cmid, C), lambda b: (0, 0)),          # Wx
                pl.BlockSpec((cmid, 1), lambda b: (0, 0)),          # bg + bx
                pl.BlockSpec((cmid, 1), lambda b: (0, 0)),          # psi weight
                pl.BlockSpec((1, 1), lambda b: (0, 0)),             # psi bias
                pl.BlockSpec((9, m1, C), lambda b: (0, 0, 0)),      # conv1 W (up half)
                pl.BlockSpec((9, m1, C), lambda b: (0, 0, 0)),      # conv1 W (attn half)
                pl.BlockSpec((m1, 1), lambda b: (0, 0)),            # conv1 bias
                pl.BlockSpec((9, m2, m1), lambda b: (0, 0, 0)),     # conv2 W
                pl.BlockSpec((m2, 1), lambda b: (0, 0)),            # conv2 bias
            ],
            out_specs=pl.BlockSpec((1, m2, n), lambda b: (b, 0, 0)),
            scratch_shapes=[pltpu.VMEM((m1, Spp), jnp.float32)],
        ),
        compiler_params=pltpu.CompilerParams(
            dimension_semantics=("parallel",),
            vmem_limit_bytes=_VMEM_LIMIT),
    )(up_pf, br_pf, mask, wg, wx, bgx, wp_col, bp, w1u, w1a, b1, w2t, b2)


# ---------------------------------------------------------------------------
# UpBlock forward
# ---------------------------------------------------------------------------
def upblock_forward(x, bridge, params, *, act="relu"):
    """x: (B, C_in, H, W); bridge: (B, C_out, 2H, 2W) -> (B, C_out, 2H, 2W)."""
    B, C_in, H, W = x.shape
    up_w, up_b = params["up_w"], params["up_b"]
    C_out = up_w.shape[1]
    H2, W2 = 2 * H, 2 * W

    # --- self.up: ConvTranspose2d(k=2, s=2) + act as a per-pixel phase GEMM --
    # out[b, o, 2i+di, 2j+dj] = bias[o] + sum_c x[b,c,i,j] * W[c,o,di,dj]
    wt = jnp.transpose(up_w, (1, 2, 3, 0)).reshape(C_out * 4, C_in)   # [(o,di,dj), c]
    bt = jnp.repeat(up_b, 4).reshape(C_out * 4, 1)
    y4 = _channel_matmul(x.reshape(B, C_in, H * W), wt, bt, act=act)  # (B, 4*C_out, HW)

    # Depth-to-space interleave + halo pad of `up` (one XLA copy).
    # TODO(synk): fuse the interleave into the ConvTranspose kernel via strided
    # lane stores to remove this last wrapper-side HBM round trip.
    up = (y4.reshape(B, C_out, 2, 2, H, W)
            .transpose(0, 1, 4, 2, 5, 3)
            .reshape(B, C_out, H2, W2))
    # TODO(synk): up_mode='upsampling' (bilinear Upsample + 1x1 conv), batch_norm,
    # dropout>0, se_block=True (SqExBlock) and the ndim=3 variant are not implemented.

    # Zero-padded flat planes: 2 pad rows top/bottom, 1 pad column left/right.
    Wp = W2 + 2
    Spp = (H2 + 4) * Wp
    up_pf = jnp.pad(up, ((0, 0), (0, 0), (2, 2), (1, 1))).reshape(B, C_out, Spp)
    br_pf = jnp.pad(bridge, ((0, 0), (0, 0), (2, 2), (1, 1))).reshape(B, C_out, Spp)
    # TODO(synk): store inter-stage activations in bf16 on bandwidth-starved
    # parts (v5e) -- needs a looser tolerance vs the f32 reference.

    # Attention-gate parameters (batch_norm=None -> biases can be folded).
    cmid = params["ag_wg"].shape[0]
    wg = params["ag_wg"].reshape(cmid, C_out)
    wx = params["ag_wx"].reshape(cmid, C_out)
    bgx = (params["ag_bg"] + params["ag_bx"]).reshape(cmid, 1)
    wp_col = params["ag_wp"].reshape(cmid, 1)
    bp = params["ag_bp"].reshape(1, 1)

    # Conv weights -> (tap, out_ch, in_ch); conv1 split into up / attn halves.
    w1 = params["conv1_w"]                                        # (C_out, 2C_out, 3, 3)
    w1u = jnp.transpose(w1[:, :C_out], (2, 3, 0, 1)).reshape(9, C_out, C_out)
    w1a = jnp.transpose(w1[:, C_out:], (2, 3, 0, 1)).reshape(9, C_out, C_out)
    b1 = params["conv1_b"].reshape(C_out, 1)
    w2t = jnp.transpose(params["conv2_w"], (2, 3, 0, 1)).reshape(9, C_out, C_out)
    b2 = params["conv2_b"].reshape(C_out, 1)

    # Validity mask over the padded-width row layout (zeroes the 2 pad columns).
    n = H2 * Wp
    col = jnp.arange(n, dtype=jnp.int32) % Wp
    mask = ((col >= 1) & (col <= W2)).astype(x.dtype).reshape(1, n)

    out_flat = _attn_doubleconv(up_pf, br_pf, mask, wg, wx, bgx, wp_col, bp,
                                w1u, w1a, b1, w2t, b2,
                                wpad=Wp, h2=H2, act=act)
    return out_flat.reshape(B, C_out, H2, Wp)[:, :, :, 1:W2 + 1]


def init_params(key, c_in, c_out):
    """PyTorch-shaped parameters: ConvTranspose2d weight is (in, out, 2, 2);
    Conv2d weights are (out, in, kH, kW)."""
    cmid = c_out // 2
    ks = jax.random.split(key, 12)
    n = lambda k, shape: jax.random.normal(k, shape, jnp.float32) * 0.1
    return {
        "up_w": n(ks[0], (c_in, c_out, 2, 2)),
        "up_b": n(ks[1], (c_out,)),
        "ag_wg": n(ks[2], (cmid, c_out, 1, 1)),
        "ag_bg": n(ks[3], (cmid,)),
        "ag_wx": n(ks[4], (cmid, c_out, 1, 1)),
        "ag_bx": n(ks[5], (cmid,)),
        "ag_wp": n(ks[6], (1, cmid, 1, 1)),
        "ag_bp": n(ks[7], (1,)),
        "conv1_w": n(ks[8], (c_out, 2 * c_out, 3, 3)),
        "conv1_b": n(ks[9], (c_out,)),
        "conv2_w": n(ks[10], (c_out, c_out, 3, 3)),
        "conv2_b": n(ks[11], (c_out,)),
    }


def _reference(x, bridge, p):
    """Pure-JAX reference of the PyTorch UpBlock forward (NCHW)."""
    B, C_in, H, W = x.shape
    w = p["up_w"]
    C_out = w.shape[1]
    y = jnp.einsum("bcij,codk->boidjk", x, w).reshape(B, C_out, 2 * H, 2 * W)
    up = jnp.maximum(y + p["up_b"][None, :, None, None], 0.0)

    cmid = p["ag_wg"].shape[0]
    wg = p["ag_wg"].reshape(cmid, C_out)
    wx = p["ag_wx"].reshape(cmid, C_out)
    g1 = jnp.einsum("mc,bchw->bmhw", wg, up) + p["ag_bg"][None, :, None, None]
    x1 = jnp.einsum("mc,bchw->bmhw", wx, bridge) + p["ag_bx"][None, :, None, None]
    a = jnp.maximum(g1 + x1, 0.0)
    wp = p["ag_wp"].reshape(1, cmid)
    psi = jnp.einsum("om,bmhw->bohw", wp, a) + p["ag_bp"][None, :, None, None]
    attn = jax.nn.sigmoid(psi) * bridge

    cat = jnp.concatenate([up, attn], axis=1)

    def conv3(z, wc, bc):
        o = jax.lax.conv_general_dilated(
            z, wc, window_strides=(1, 1), padding="SAME",
            dimension_numbers=("NCHW", "OIHW", "NCHW"))
        return jnp.maximum(o + bc[None, :, None, None], 0.0)

    h = conv3(cat, p["conv1_w"], p["conv1_b"])
    return conv3(h, p["conv2_w"], p["conv2_b"])


if __name__ == "__main__":
    key = jax.random.PRNGKey(0)
    k_x, k_b, k_p = jax.random.split(key, 3)

    B, C_in, C_out, H, W = 2, 8, 4, 16, 16
    x = jax.random.normal(k_x, (B, C_in, H, W), jnp.float32)
    bridge = jax.random.normal(k_b, (B, C_out, 2 * H, 2 * W), jnp.float32)
    params = init_params(k_p, C_in, C_out)

    out = upblock_forward(x, bridge, params)
    out = jax.block_until_ready(out)

    ref = _reference(x, bridge, params)
    assert out.shape == (B, C_out, 2 * H, 2 * W), out.shape
    err = float(jnp.max(jnp.abs(out - ref)))
    assert jnp.allclose(out, ref, atol=5e-4, rtol=5e-4), err

    print("KERNEL_OK")
</pallas_src>

<mosaic_0001>
module attributes {stable_mosaic.version = 11 : i64} {
  func.func @_matmul_bias_act_kernel(%arg0: i32, %arg1: i32, %arg2: memref<1x8x256xf32, #tpu.memory_space<vmem>>, %arg3: memref<16x8xf32, #tpu.memory_space<vmem>>, %arg4: memref<16x1xf32, #tpu.memory_space<vmem>>, %arg5: memref<1x16x256xf32, #tpu.memory_space<vmem>>) attributes {dimension_semantics = [#tpu.dimension_semantics<parallel>, #tpu.dimension_semantics<parallel>], iteration_bounds = array<i64: 2, 1>, scalar_prefetch = 0 : i64, scratch_operands = 0 : i64, tpu.core_type = #tpu.core_type<tc>, window_params = [{transform_indices = @transform_0, window_bounds = array<i64: 1, 8, 256>}, {pipeline_mode = #tpu.pipeline_mode<synchronous>, transform_indices = @transform_1, window_bounds = array<i64: 16, 8>}, {pipeline_mode = #tpu.pipeline_mode<synchronous>, transform_indices = @transform_2, window_bounds = array<i64: 16, 1>}, {transform_indices = @transform_3, window_bounds = array<i64: 1, 16, 256>}]} {
    %c0 = arith.constant 0 : index
    %c0_0 = arith.constant 0 : index
    %c0_1 = arith.constant 0 : index
    %0 = vector.load %arg2[%c0, %c0_0, %c0_1] : memref<1x8x256xf32, #tpu.memory_space<vmem>>, vector<1x8x256xf32>
    %1 = vector.shape_cast %0 : vector<1x8x256xf32> to vector<8x256xf32>
    %c0_2 = arith.constant 0 : index
    %c0_3 = arith.constant 0 : index
    %2 = vector.load %arg3[%c0_2, %c0_3] : memref<16x8xf32, #tpu.memory_space<vmem>>, vector<16x8xf32>
    %cst = arith.constant dense<0.000000e+00> : vector<16x256xf32>
    %3 = tpu.matmul %2, %1, %cst {dimension_numbers = #tpu.dot_dimension_numbers<[1], [0], [0], [1], [0, 0, 1, 1], [], []>} : vector<16x8xf32>, vector<8x256xf32>, vector<16x256xf32> -> vector<16x256xf32>
    %c0_4 = arith.constant 0 : index
    %c0_5 = arith.constant 0 : index
    %4 = vector.load %arg4[%c0_4, %c0_5] : memref<16x1xf32, #tpu.memory_space<vmem>>, vector<16x1xf32>
    %5 = vector.broadcast %4 : vector<16x1xf32> to vector<16x256xf32>
    %6 = arith.addf %3, %5 : vector<16x256xf32>
    %cst_6 = arith.constant 0.000000e+00 : f32
    %7 = vector.broadcast %cst_6 : f32 to vector<16x256xf32>
    %8 = arith.maximumf %6, %7 : vector<16x256xf32>
    %c0_7 = arith.constant 0 : index
    %c0_8 = arith.constant 0 : index
    %c0_9 = arith.constant 0 : index
    %9 = vector.load %arg5[%c0_7, %c0_8, %c0_9] : memref<1x16x256xf32, #tpu.memory_space<vmem>>, vector<1x16x256xf32>
    %10 = vector.shape_cast %9 : vector<1x16x256xf32> to vector<16x256xf32>
    %11 = vector.shape_cast %8 : vector<16x256xf32> to vector<1x16x256xf32>
    tpu.vector_store %arg5[%c0_7, %c0_8, %c0_9], %11 {strides = array<i32>} : memref<1x16x256xf32, #tpu.memory_space<vmem>>, vector<1x16x256xf32>,
    return
  }
  func.func @transform_0(%arg0: i32, %arg1: i32) -> (i32, i32, i32) {
    %c0_i32 = arith.constant 0 : i32
    %c0_i32_0 = arith.constant 0 : i32
    return %arg0, %c0_i32, %arg1 : i32, i32, i32
  }
  func.func @transform_1(%arg0: i32, %arg1: i32) -> (i32, i32) {
    %c0_i32 = arith.constant 0 : i32
    %c0_i32_0 = arith.constant 0 : i32
    %c0_i32_1 = arith.constant 0 : i32
    return %c0_i32, %c0_i32_0 : i32, i32
  }
  func.func @transform_2(%arg0: i32, %arg1: i32) -> (i32, i32) {
    %c0_i32 = arith.constant 0 : i32
    %c0_i32_0 = arith.constant 0 : i32
    %c0_i32_1 = arith.constant 0 : i32
    return %c0_i32, %c0_i32_0 : i32, i32
  }
  func.func @transform_3(%arg0: i32, %arg1: i32) -> (i32, i32, i32) {
    %c0_i32 = arith.constant 0 : i32
    %c0_i32_0 = arith.constant 0 : i32
    return %arg0, %c0_i32, %arg1 : i32, i32, i32
  }
}

</mosaic_0001>

<bundles_post_ra>
// kernel: tpu_custom_call.1
= control target key start
LH: loop header
LB: loop body
LE: loop exit
PB: predicated region body
PF: predicated region fallthrough
CT: control target
= control target key end

     0   :  { %8 = vsyncpa [#allocation3], 0  ;;  %s666_s0 = inlined_call_operand.vmem [shape: f32[2,8,256], index: 0, kind: input, shape index: {}]   ;;  %s667_s1 = inlined_call_operand.vmem [shape: f32[16,8], index: 1, kind: input, shape index: {}]   ;;  %s668_s2 = inlined_call_operand.vmem [shape: f32[16,1], index: 2, kind: input, shape index: {}]   ;;  %s669_s3 = inlined_call_operand.hbm [shape: f32[2,16,256], index: 3, kind: output, shape index: {}]  }
   0x1   :  { %10 = vsyncpa [#allocation3 + $0x1], 0  ;;  %s557_s12 = smov 0   ;;  %s559_s13 = smov 0  }
   0x2   :  { %s561_s14 = smov 0   ;;  %s563_s15 = smov 0  }
   0x3   :  { %s565_s16 = smov 0   ;;  %s567_s17 = smov 0  }
   0x4 LB: > { %s374_s18 = sadd.s32 4294967295, %s532_s17   ;;  %s375_s19 = sadd.s32 4294967294, %s532_s17   ;;  %s532_s17 = sphi %s567_s17, %s16_s17   ;;  %s528_s16 = sphi %s565_s16, %s676_s16   ;;  %s524_s15 = sphi %s563_s15, %s675_s15   ;;  %s520_s14 = sphi %s561_s14, %s674_s14   ;;  %s516_s13 = sphi %s559_s13, %s673_s13   ;;  %s512_s12 = sphi %s557_s12, %s672_s12  }
   0x5   : > { %s28_s20 = sadd.s32 1, %s528_s16  ;;  %s107_s21 = sadd.s32 1, %s520_s14 }
   0x6   : > { %p30_p0 = scmp.ge.s32.totalorder %s28_s20, 2  ;;  %p117_p1 = scmp.ne.s32.totalorder %s520_s14, %s516_s13 }
   0x7   : > { %p118_p2 = scmp.eq.s32.totalorder %s374_s18, 1  ;;  %p123_p3 = scmp.ne.s32.totalorder %s516_s13, %s512_s12 }
   0x8   : > { %s678_s20 = smov (%p30_p0, %s28_s20), 0  ;;  %p124_p5 = scmp.eq.s32.totalorder %s375_s19, 1 }
   0x9   : > { %p597_p4 = por %p118_p2, %p117_p1  ;;  %s102_s23 = ssub.s32 %s528_s16, %s678_s20 }
   0xa   : > { %p378_p6 = scmp.ge.s32.totalorder %s532_s17, 1  ;;  %p105_p7 = scmp.eq.s32.totalorder %s102_s23, 0 }
   0xb   : > { %p604_p8 = por %p124_p5, %p123_p3  ;;  %p161_p9 = scmp.lt.s32.totalorder %s532_s17, 3 }
   0xc   : > { %s610_s25 = scalar_select %p105_p7, %s520_s14, %s107_s21  }
   0xd   : > { %p162_p10 = pnand %p378_p6, %p161_p9 }
   0xe   : > { %p190_p11 = scmp.lt.s32.totalorder (!%p162_p10), %s524_s15, 1  ;;  %s186_s18 = sand.u32 (!%p162_p10), 1, %s516_s13  }
   0xf   : > { %165 = sbr.rel (%p162_p10) target bundleno = 168 (0xa8), region = 32  ;;  %s379_s19 = sshll.u32 (!%p162_p10), %s186_s18, 5 }
  0x10   : > { %s392_s21 = sshll.u32 (!%p162_p10), %s524_s15, 5  ;;  %s474_s8 = scalar_lea.hbm (!%p162_p10), %s669_s3, 64 }
  0x11   : > { %s291_s27 = scalar_lea.hbm (!%p162_p10), %s669_s3, %s392_s21 }
  0x12   : > { %s294_s30 = sshll.u32 (!%p162_p10), %s291_s27, 4  ;;  %s295_s30 = int_to_ptr.hbm [resolvable:$true] %s294_s30 }
  0x13   : > { %s468_s4 = sshra.s32 (!%p162_p10), %s295_s30, 4  ;;  %s469_s4 = int_to_ptr.hbm [resolvable:$true] %s468_s4 }
  0x14   : > { %v204_v0 = vld [vmem:[%s668_s2] sm:$0xff]  ;;  %v534_v1 = vmov 0   ;;  %s191_s28 = scalar_select %p190_p11, %s524_s15, 1  ;;  %vm216_vm0 = vcmask 64512   ;;  %v203_v5 = vld [vmem:[%s667_s1 + $0x8] sm:$0xff] }
  0x15   : > { %453 = vset.pattern.permute.xlu0 %v534_v1  ;;  %v202_v2 = vld [vmem:[%s667_s1] sm:$0xff]  ;;  %v205_v6 = vld [vmem:[%s668_s2 + $0x8] sm:$0xff]  ;;  %s278_s15 = scalar_lea.sflag [#allocation3], %s186_s18  ;;  %p475_p1 = scmp.lt.s32.totalorder %s469_s4, %s669_s3 }
  0x16   : > { %208 = vperm.xlu0 %453, %v204_v0   ;;  %s391_s29 = sshll.u32 %s191_s28, 4  ;;  %s188_s28 = scalar_lea.vmem [#allocation2], %s379_s19 }
  0x17   : > { %s197_s5 = scalar_lea.vmem %s666_s0, %s391_s29  ;;  %s292_s29 = sshll.u32 %s188_s28, 4  ;;  %s293_s29 = int_to_ptr.vmem [resolvable:$true] %s292_s29 }
  0x18   : > { %v200_v3 = vld [vmem:[%s197_s5] sm:$0xff]  ;;  %v201_v4 = vld [vmem:[%s197_s5 + $0x8] sm:$0xff]  ;;  %s470_s5 = scalar_lea.hbm %s469_s4, 32 }
  0x19   : > { %238 = vmatpush.msra.mxu0 %v200_v3  ;;  %393 = vmatpush.msra.mxu2 %v200_v3  ;;  %p471_p12 = scmp.ne.s32.totalorder %s469_s4, %s470_s5  ;;  %p476_p2 = scmp.lt.s32.totalorder %s474_s8, %s470_s5 }
  0x1a   : > { %261 = vmatpush.msra.mxu1 %v201_v4  ;;  %394 = vmatpush.msra.mxu3 %v201_v4 }
  0x1b   : > { %382 = vmatmul.msk.f32.vlgmr.msra.gmra.mxu0 %vm216_vm0, %v202_v2  ;;  %383 = vmatmul.msk.f32.vlgmr.msra.gmra.mxu2 %vm216_vm0, %v203_v5  ;;  %p472_p13 = pnand %p471_p12, %p597_p4  ;;  %p477_p3 = por %p476_p2, %p475_p1 }
  0x1c   : > { %384 = vmatmul.msk.f32.vlgmr.msra.gmra.mxu1 %vm216_vm0, %v202_v2  ;;  %385 = vmatmul.msk.f32.vlgmr.msra.gmra.mxu3 %vm216_vm0, %v203_v5 }
  0x1d   : > { %p473_p0 = pneg %p472_p13 }
  0x1e   : > { %213 = vperm.xlu0 %453, %v205_v6  }
  0x1f   : > { %p478_p5 = pnand %p477_p3, %p473_p0 }
  0x88   : > { %v209_v7 = vpop.permute.xlu0 %208 }
  0x90   : > { %v214_v14 = vpop.permute.xlu0 %213 }
  0x98   : > { %v240_v8 = vpop.f32.mrf.mxu0 }
  0x99   : > { %v241_v9 = vadd.f32 %v240_v8, %v209_v7  ;;  %v263_v10 = vpop.f32.mrf.mxu1 }
  0x9a   : > { %v264_v11 = vadd.f32 %v263_v10, %v209_v7 }
  0x9b   : > { %v269_v12 = vmax.f32 %v241_v9, 0.0 }
  0x9c   : > { %v270_v13 = vmax.f32 %v264_v11, 0.0 }
  0x9d   : > { %273 = vst [vmem:[%s188_s28] sm:$0xff] %v269_v12 }
  0x9e   : > { %274 = vst [vmem:[%s188_s28 + $0x8] sm:$0xff] %v270_v13  ;;  %v243_v15 = vpop.f32.mrf.mxu2 }
  0x9f   : > { %v244_v16 = vadd.f32 %v243_v15, %v214_v14  ;;  %v266_v17 = vpop.f32.mrf.mxu3 }
  0xa0   : > { %v267_v18 = vadd.f32 %v266_v17, %v214_v14 }
  0xa1   : > { %v271_v19 = vmax.f32 %v244_v16, 0.0 }
  0xa2   : > { %v272_v20 = vmax.f32 %v267_v18, 0.0 }
  0xa3   : > { %275 = vst [vmem:[%s188_s28 + $0x10] sm:$0xff] %v271_v19 }
  0xa4   : > { %276 = vst [vmem:[%s188_s28 + $0x18] sm:$0xff] %v272_v20 }
  0xa5   : > { %481 = shalt.err (!%p478_p5)
}
  0xa6   : > { %s535_s11 = smov 256   ;;  %s536_s18 = smov 16  }
  0xa7   : > { %395 = dma.vmem_to_hbm [thread:$0]  (%p597_p4), %s293_s29, 512, %s295_s30, %s278_s15, %s535_s11, %s535_s11, %s536_s18  }
  0xa8 PF: > { %p401_p6 = scmp.ge.s32.totalorder %s532_s17, 2  ;;  %s309_s19 = sand.u32 1, %s512_s12  }
  0xa9   : > { %s310_s21 = scalar_lea.sflag [#allocation3], %s309_s19 }
  0xaa   : > { %p398_p7 = pnand %p401_p6, %p604_p8 }
  0xac   : > { %p399_p9 = pneg %p398_p7 }
  0xae   : > { %507 = dma.done.wait (%p399_p9), %s310_s21, 512  }
  0xaf   : > { %509 = vsyncadd (%p399_p9), %s310_s21, 4294966784  ;;  %s16_s17 = sadd.s32 1, %s532_s17   ;;  %s672_s12 = smov %s516_s13 }
  0xb0   : > { %p13_p10 = scmp.ge.s32.totalorder %s16_s17, 4   ;;  %s673_s13 = smov %s520_s14 }
  0xb1   : > { %s674_s14 = smov %s610_s25  ;;  %s675_s15 = smov %s528_s16 }
  0xb2   : > { %s676_s16 = smov %s678_s20  ;;  %15 = sbr.rel (!%p13_p10) target bundleno = 4 (0x4), region = 67 }
  0xb7   :  { %316 = vsyncpa [#allocation3], 1 }
  0xb8   :  { %318 = vsyncpa [#allocation3 + $0x1], 1 }

</bundles_post_ra>
